<compile_context>
chip_gen: v7x
topology: tpu7x:2x2x1
jax: 0.10.0
libtpu: 0.0.40
codegen_flags: <defaults>
</compile_context>

<pallas_src>
import math
from functools import partial

import jax
import jax.numpy as jnp
from jax import lax
from jax.experimental import pallas as pl
from jax.experimental.pallas import tpu as pltpu


def _pick_tile(n: int, target: int) -> int:
    """Largest tile <= target that divides n (full extent if n <= target)."""
    if n <= target:
        return n
    for t in (target, 512, 256, 128, 64, 32, 16, 8):
        if t <= target and n % t == 0:
            return t
    # TODO(synk): pad ragged extents instead of falling back to the full extent.
    return n


# --------------------------------------------------------------------------- #
# Tiled linear kernel: out[tm, Cout] = x[tm, Cin] @ W[Cin, Cout] + b[1, Cout]  #
# --------------------------------------------------------------------------- #
def _linear_kernel(x_ref, w_ref, b_ref, o_ref):
    # x/w are bf16 MXU operands (x cast in the wrapper), accumulation in f32.
    acc = jnp.dot(x_ref[...], w_ref[...], preferred_element_type=jnp.float32)
    o_ref[...] = (acc + b_ref[...]).astype(o_ref.dtype)


def _linear(x2d_bf16, w_bf16, b_f32, out_dtype, *, tm_target=512,
            vmem_limit=64 * 1024 * 1024):
    M, Cin = x2d_bf16.shape
    Cout = w_bf16.shape[1]
    tm = _pick_tile(M, tm_target)
    b2d = b_f32.reshape(1, Cout)

    # TODO(synk): for very large C (weight > ~16 MiB bf16) add an N-tiling axis instead
    # of keeping the full weight resident, to fit v7x's 64 MiB VMEM.
    def build(single_buffer_invariants: bool):
        inv = dict(pipeline_mode=pl.Buffered(1)) if single_buffer_invariants else {}
        return pl.pallas_call(
            _linear_kernel,
            out_shape=jax.ShapeDtypeStruct((M, Cout), out_dtype),
            grid_spec=pltpu.PrefetchScalarGridSpec(
                num_scalar_prefetch=0,
                grid=(M // tm,),
                in_specs=[
                    pl.BlockSpec((tm, Cin), lambda i: (i, 0)),          # activations
                    pl.BlockSpec((Cin, Cout), lambda i: (0, 0), **inv),  # weight (invariant)
                    pl.BlockSpec((1, Cout), lambda i: (0, 0), **inv),    # bias (invariant)
                ],
                out_specs=pl.BlockSpec((tm, Cout), lambda i: (i, 0)),
            ),
            compiler_params=pltpu.CompilerParams(
                dimension_semantics=("parallel",),
                vmem_limit_bytes=vmem_limit),
        )

    try:
        # Don't double-buffer grid-invariant weight/bias blocks (frees a weight copy of VMEM).
        return build(True)(x2d_bf16, w_bf16, b2d)
    except Exception:
        # Fallback: default (double-buffered) pipelining if Buffered(1) is unsupported.
        return build(False)(x2d_bf16, w_bf16, b2d)


# --------------------------------------------------------------------------- #
# Flash-attention kernel over a triangular (q-tile, kv-tile) step axis.       #
# --------------------------------------------------------------------------- #
def _flash_kernel(qi_tbl_ref, ki_tbl_ref, q_ref, k_ref, v_ref, o_ref,
                  m_sc, l_sc, acc_sc, *, tq, tk):
    step = pl.program_id(2)
    qi = qi_tbl_ref[step]          # q-tile index for this step (SMEM scalar)
    ki = ki_tbl_ref[step]          # kv-tile index for this step (SMEM scalar)

    @pl.when(ki == 0)
    def _init():
        m_sc[...] = jnp.full(m_sc.shape, -jnp.inf, jnp.float32)
        l_sc[...] = jnp.zeros(l_sc.shape, jnp.float32)
        acc_sc[...] = jnp.zeros(acc_sc.shape, jnp.float32)

    q = q_ref[...]                                       # (tq, hd) bf16 (pre-scaled)
    k = k_ref[...]                                       # (tk, hd) bf16
    v = v_ref[...]                                       # (tk, hd) bf16

    # s = q @ k^T: contract last dims directly -> no materialized transpose.
    s = lax.dot_general(q, k, (((1,), (1,)), ((), ())),
                        preferred_element_type=jnp.float32)   # (tq, tk) f32

    # Only tiles that straddle the diagonal need masking; strictly-below tiles skip it.
    def _apply_mask(s_):
        row = qi * tq + lax.broadcasted_iota(jnp.int32, (tq, 1), 0)
        col = ki * tk + lax.broadcasted_iota(jnp.int32, (1, tk), 1)
        return jnp.where(col <= row, s_, -1e30)          # finite mask value (NaN-safe)

    s = lax.cond(ki * tk + (tk - 1) > qi * tq, _apply_mask, lambda s_: s_, s)

    # Online softmax update (statistics kept in f32).
    m_prev = m_sc[...]
    m_new = jnp.maximum(m_prev, jnp.max(s, axis=-1, keepdims=True))
    alpha = jnp.exp(m_prev - m_new)
    p = jnp.exp(s - m_new)

    l_sc[...] = alpha * l_sc[...] + jnp.sum(p, axis=-1, keepdims=True)
    acc_sc[...] = alpha * acc_sc[...] + jnp.dot(
        p.astype(jnp.bfloat16), v, preferred_element_type=jnp.float32)
    m_sc[...] = m_new

    # Finalize on the last *valid* kv tile of this q tile.
    @pl.when(ki == (qi * tq + (tq - 1)) // tk)
    def _finalize():
        inv_l = pl.reciprocal(l_sc[...], approx=True)    # EUP vrcp, essentially free
        o_ref[...] = (acc_sc[...] * inv_l).astype(o_ref.dtype)


# --------------------------------------------------------------------------- #
# One-time parameter preprocessing (hoisted out of the per-forward wrapper).  #
# --------------------------------------------------------------------------- #
def prepare_params(w_attn, b_attn, w_proj, b_proj, *, n_head):
    """w_attn: (C, 3C), b_attn: (3C,), w_proj: (C, C), b_proj: (C,) — (in, out) layout."""
    C = w_attn.shape[0]
    assert C % n_head == 0
    hd = C // n_head
    scale = 1.0 / math.sqrt(hd)
    # Fold the 1/sqrt(hd) attention scale into the q columns of c_attn (identical math).
    w_attn = jnp.asarray(w_attn, jnp.float32).at[:, :C].multiply(scale)
    b_attn = jnp.asarray(b_attn, jnp.float32).at[:C].multiply(scale)
    return dict(
        n_head=n_head,
        w_attn=w_attn.astype(jnp.bfloat16),
        b_attn=b_attn,                                    # f32
        w_proj=jnp.asarray(w_proj, jnp.float32).astype(jnp.bfloat16),
        b_proj=jnp.asarray(b_proj, jnp.float32),
    )


# --------------------------------------------------------------------------- #
# Full module forward                                                         #
# --------------------------------------------------------------------------- #
def causal_self_attention(x, params, *, tq_target=256, tk_target=128, row_tile=512):
    """x: (B, T, C). params from prepare_params."""
    x = jnp.asarray(x)
    B, T, C = x.shape
    n_head = params["n_head"]
    hd = C // n_head

    # --- c_attn: (B*T, C) @ (C, 3C) + b  (activations cast to bf16 in the wrapper) ---
    x2d = x.reshape(B * T, C).astype(jnp.bfloat16)
    qkv = _linear(x2d, params["w_attn"], params["b_attn"], jnp.bfloat16,
                  tm_target=row_tile)                              # (B*T, 3C) bf16

    # --- head-major layout in a single fused transpose: (3, B, H, T, hd) ---
    qkv = qkv.reshape(B, T, 3, n_head, hd).transpose(2, 0, 3, 1, 4)
    q, k, v = qkv[0], qkv[1], qkv[2]                               # (B, H, T, hd) each

    tq = _pick_tile(T, tq_target)
    tk = _pick_tile(T, tk_target)
    n_q = T // tq

    # Triangular step tables: enumerate only causally-valid (qi, ki) tiles.
    qi_list, ki_list = [], []
    for qi in range(n_q):
        last_k = (qi * tq + tq - 1) // tk
        for ki in range(last_k + 1):
            qi_list.append(qi)
            ki_list.append(ki)
    n_steps = len(qi_list)
    qi_tbl = jnp.asarray(qi_list, dtype=jnp.int32)
    ki_tbl = jnp.asarray(ki_list, dtype=jnp.int32)

    # TODO(synk): on v7x, batch 2 heads per grid step when hd < 128 to halve step count.
    y = pl.pallas_call(
        partial(_flash_kernel, tq=tq, tk=tk),
        out_shape=jax.ShapeDtypeStruct((B, n_head, T, hd), jnp.bfloat16),
        grid_spec=pltpu.PrefetchScalarGridSpec(
            num_scalar_prefetch=2,
            grid=(B, n_head, n_steps),
            in_specs=[
                pl.BlockSpec((None, None, tq, hd),
                             lambda b, h, s, qi_t, ki_t: (b, h, qi_t[s], 0)),
                pl.BlockSpec((None, None, tk, hd),
                             lambda b, h, s, qi_t, ki_t: (b, h, ki_t[s], 0)),
                pl.BlockSpec((None, None, tk, hd),
                             lambda b, h, s, qi_t, ki_t: (b, h, ki_t[s], 0)),
            ],
            out_specs=pl.BlockSpec((None, None, tq, hd),
                                   lambda b, h, s, qi_t, ki_t: (b, h, qi_t[s], 0)),
            scratch_shapes=[
                pltpu.VMEM((tq, 1), jnp.float32),     # running max m
                pltpu.VMEM((tq, 1), jnp.float32),     # running denom l
                pltpu.VMEM((tq, hd), jnp.float32),    # output accumulator
            ],
        ),
        compiler_params=pltpu.CompilerParams(
            dimension_semantics=("parallel", "parallel", "arbitrary"),
            vmem_limit_bytes=32 * 1024 * 1024),
    )(qi_tbl, ki_tbl, q, k, v)

    # --- back to (B*T, C) with a single transpose, then c_proj ---
    y2d = y.transpose(0, 2, 1, 3).reshape(B * T, C)                # bf16 already
    out = _linear(y2d, params["w_proj"], params["b_proj"], x.dtype,
                  tm_target=row_tile)
    return out.reshape(B, T, C)


# --------------------------------------------------------------------------- #
# Pure-JAX f32 reference mirroring the PyTorch module                         #
# --------------------------------------------------------------------------- #
def causal_self_attention_ref(x, w_attn, b_attn, w_proj, b_proj, *, n_head):
    B, T, C = x.shape
    hd = C // n_head
    qkv = x @ w_attn + b_attn                                    # (B, T, 3C)
    q, k, v = jnp.split(qkv, 3, axis=2)
    q = q.reshape(B, T, n_head, hd).transpose(0, 2, 1, 3)
    k = k.reshape(B, T, n_head, hd).transpose(0, 2, 1, 3)
    v = v.reshape(B, T, n_head, hd).transpose(0, 2, 1, 3)
    att = (q @ jnp.swapaxes(k, -2, -1)) * (1.0 / math.sqrt(hd))
    mask = jnp.tril(jnp.ones((T, T), dtype=bool))
    att = jnp.where(mask[None, None], att, -jnp.inf)
    att = jax.nn.softmax(att, axis=-1)
    y = att @ v                                                  # (B, H, T, hd)
    y = y.transpose(0, 2, 1, 3).reshape(B, T, C)
    return y @ w_proj + b_proj


if __name__ == "__main__":
    def _run_case(B, T, C, n_head, tq_target, tk_target):
        key = jax.random.PRNGKey(0)
        kx, kw1, kb1, kw2, kb2 = jax.random.split(key, 5)
        x = jax.random.normal(kx, (B, T, C), dtype=jnp.float32)
        # nn.Linear(C, 3C): weight (3C, C), bias (3C). Stored transposed (C, 3C).
        w_attn = jax.random.normal(kw1, (C, 3 * C), dtype=jnp.float32) * 0.02
        b_attn = jax.random.normal(kb1, (3 * C,), dtype=jnp.float32) * 0.02
        w_proj = jax.random.normal(kw2, (C, C), dtype=jnp.float32) * 0.02
        b_proj = jax.random.normal(kb2, (C,), dtype=jnp.float32) * 0.02

        params = prepare_params(w_attn, b_attn, w_proj, b_proj, n_head=n_head)
        out = causal_self_attention(x, params, tq_target=tq_target,
                                    tk_target=tk_target)
        out = jax.block_until_ready(out)
        ref = causal_self_attention_ref(x, w_attn, b_attn, w_proj, b_proj,
                                        n_head=n_head)
        assert out.shape == (B, T, C)
        # bf16 MXU operands + approx reciprocal -> looser tolerance than pure f32.
        assert jnp.allclose(out, ref, atol=2e-2, rtol=2e-2), \
            f"mismatch vs reference (max abs diff {jnp.max(jnp.abs(out - ref))})"

    # Toy module config (n_embd=32, n_head=4): single-step path.
    _run_case(B=2, T=8, C=32, n_head=4, tq_target=256, tk_target=128)
    # Longer sequence with small, decoupled tq/tk tiles: exercises the triangular grid,
    # multi-step online softmax, diagonal-straddle masking, and init/finalize predicates.
    _run_case(B=2, T=64, C=32, n_head=4, tq_target=16, tk_target=8)

    print("KERNEL_OK")
</pallas_src>

<mosaic_0001>
module attributes {stable_mosaic.version = 11 : i64} {
  func.func @_linear_kernel(%arg0: i32, %arg1: memref<16x32xbf16, #tpu.memory_space<vmem>>, %arg2: memref<32x96xbf16, #tpu.memory_space<vmem>>, %arg3: memref<1x96xf32, #tpu.memory_space<vmem>>, %arg4: memref<16x96xbf16, #tpu.memory_space<vmem>>) attributes {dimension_semantics = [#tpu.dimension_semantics<parallel>], iteration_bounds = array<i64: 1>, scalar_prefetch = 0 : i64, scratch_operands = 0 : i64, tpu.core_type = #tpu.core_type<tc>, window_params = [{transform_indices = @transform_0, window_bounds = array<i64: 16, 32>}, {pipeline_mode = #tpu.pipeline_mode<synchronous>, transform_indices = @transform_1, window_bounds = array<i64: 32, 96>}, {pipeline_mode = #tpu.pipeline_mode<synchronous>, transform_indices = @transform_2, window_bounds = array<i64: 1, 96>}, {transform_indices = @transform_3, window_bounds = array<i64: 16, 96>}]} {
    %c0 = arith.constant 0 : index
    %c0_0 = arith.constant 0 : index
    %0 = vector.load %arg1[%c0, %c0_0] : memref<16x32xbf16, #tpu.memory_space<vmem>>, vector<16x32xbf16>
    %c0_1 = arith.constant 0 : index
    %c0_2 = arith.constant 0 : index
    %1 = vector.load %arg2[%c0_1, %c0_2] : memref<32x96xbf16, #tpu.memory_space<vmem>>, vector<32x96xbf16>
    %cst = arith.constant dense<0.000000e+00> : vector<16x96xf32>
    %2 = tpu.matmul %0, %1, %cst {dimension_numbers = #tpu.dot_dimension_numbers<[1], [0], [0], [1], [0, 0, 1, 1], [], []>} : vector<16x32xbf16>, vector<32x96xbf16>, vector<16x96xf32> -> vector<16x96xf32>
    %c0_3 = arith.constant 0 : index
    %c0_4 = arith.constant 0 : index
    %3 = vector.load %arg3[%c0_3, %c0_4] : memref<1x96xf32, #tpu.memory_space<vmem>>, vector<1x96xf32>
    %4 = vector.broadcast %3 : vector<1x96xf32> to vector<16x96xf32>
    %5 = arith.addf %2, %4 : vector<16x96xf32>
    %6 = arith.truncf %5 : vector<16x96xf32> to vector<16x96xbf16>
    %c0_5 = arith.constant 0 : index
    %c0_6 = arith.constant 0 : index
    %7 = vector.load %arg4[%c0_5, %c0_6] : memref<16x96xbf16, #tpu.memory_space<vmem>>, vector<16x96xbf16>
    tpu.vector_store %arg4[%c0_5, %c0_6], %6 {strides = array<i32>} : memref<16x96xbf16, #tpu.memory_space<vmem>>, vector<16x96xbf16>,
    return
  }
  func.func @transform_0(%arg0: i32) -> (i32, i32) {
    %c0_i32 = arith.constant 0 : i32
    %c0_i32_0 = arith.constant 0 : i32
    return %arg0, %c0_i32 : i32, i32
  }
  func.func @transform_1(%arg0: i32) -> (i32, i32) {
    %c0_i32 = arith.constant 0 : i32
    %c0_i32_0 = arith.constant 0 : i32
    %c0_i32_1 = arith.constant 0 : i32
    return %c0_i32, %c0_i32_0 : i32, i32
  }
  func.func @transform_2(%arg0: i32) -> (i32, i32) {
    %c0_i32 = arith.constant 0 : i32
    %c0_i32_0 = arith.constant 0 : i32
    %c0_i32_1 = arith.constant 0 : i32
    return %c0_i32, %c0_i32_0 : i32, i32
  }
  func.func @transform_3(%arg0: i32) -> (i32, i32) {
    %c0_i32 = arith.constant 0 : i32
    %c0_i32_0 = arith.constant 0 : i32
    return %arg0, %c0_i32 : i32, i32
  }
}

module attributes {stable_mosaic.version = 11 : i64} {
  func.func @_linear_kernel(%arg0: i32, %arg1: memref<16x32xbf16, #tpu.memory_space<vmem>>, %arg2: memref<32x96xbf16, #tpu.memory_space<vmem>>, %arg3: memref<1x96xf32, #tpu.memory_space<vmem>>, %arg4: memref<16x96xbf16, #tpu.memory_space<vmem>>) attributes {dimension_semantics = [#tpu.dimension_semantics<parallel>], iteration_bounds = array<i64: 1>, scalar_prefetch = 0 : i64, scratch_operands = 0 : i64, tpu.core_type = #tpu.core_type<tc>, window_params = [{transform_indices = @transform_0, window_bounds = array<i64: 16, 32>}, {pipeline_mode = #tpu.pipeline_mode<synchronous>, transform_indices = @transform_1, window_bounds = array<i64: 32, 96>}, {pipeline_mode = #tpu.pipeline_mode<synchronous>, transform_indices = @transform_2, window_bounds = array<i64: 1, 96>}, {transform_indices = @transform_3, window_bounds = array<i64: 16, 96>}]} {
    %c0 = arith.constant 0 : index
    %c0_0 = arith.constant 0 : index
    %0 = vector.load %arg1[%c0, %c0_0] : memref<16x32xbf16, #tpu.memory_space<vmem>>, vector<16x32xbf16>
    %c0_1 = arith.constant 0 : index
    %c0_2 = arith.constant 0 : index
    %1 = vector.load %arg2[%c0_1, %c0_2] : memref<32x96xbf16, #tpu.memory_space<vmem>>, vector<32x96xbf16>
    %cst = arith.constant dense<0.000000e+00> : vector<16x96xf32>
    %2 = tpu.matmul %0, %1, %cst {dimension_numbers = #tpu.dot_dimension_numbers<[1], [0], [0], [1], [0, 0, 1, 1], [], []>} : vector<16x32xbf16>, vector<32x96xbf16>, vector<16x96xf32> -> vector<16x96xf32>
    %c0_3 = arith.constant 0 : index
    %c0_4 = arith.constant 0 : index
    %3 = vector.load %arg3[%c0_3, %c0_4] : memref<1x96xf32, #tpu.memory_space<vmem>>, vector<1x96xf32>
    %4 = vector.broadcast %3 : vector<1x96xf32> to vector<16x96xf32>
    %5 = arith.addf %2, %4 : vector<16x96xf32>
    %6 = arith.truncf %5 : vector<16x96xf32> to vector<16x96xbf16>
    %c0_5 = arith.constant 0 : index
    %c0_6 = arith.constant 0 : index
    %7 = vector.load %arg4[%c0_5, %c0_6] : memref<16x96xbf16, #tpu.memory_space<vmem>>, vector<16x96xbf16>
    tpu.vector_store %arg4[%c0_5, %c0_6], %6 {strides = array<i32>} : memref<16x96xbf16, #tpu.memory_space<vmem>>, vector<16x96xbf16>,
    return
  }
  func.func @transform_0(%arg0: i32) -> (i32, i32) {
    %c0_i32 = arith.constant 0 : i32
    %c0_i32_0 = arith.constant 0 : i32
    return %arg0, %c0_i32 : i32, i32
  }
  func.func @transform_1(%arg0: i32) -> (i32, i32) {
    %c0_i32 = arith.constant 0 : i32
    %c0_i32_0 = arith.constant 0 : i32
    %c0_i32_1 = arith.constant 0 : i32
    return %c0_i32, %c0_i32_0 : i32, i32
  }
  func.func @transform_2(%arg0: i32) -> (i32, i32) {
    %c0_i32 = arith.constant 0 : i32
    %c0_i32_0 = arith.constant 0 : i32
    %c0_i32_1 = arith.constant 0 : i32
    return %c0_i32, %c0_i32_0 : i32, i32
  }
  func.func @transform_3(%arg0: i32) -> (i32, i32) {
    %c0_i32 = arith.constant 0 : i32
    %c0_i32_0 = arith.constant 0 : i32
    return %arg0, %c0_i32 : i32, i32
  }
}

</mosaic_0001>

<bundles_post_ra>
// kernel: tpu_custom_call.1
= control target key start
LH: loop header
LB: loop body
LE: loop exit
PB: predicated region body
PF: predicated region fallthrough
CT: control target
= control target key end

     0   :  { %8 = vsyncpa [#allocation3], 0  ;;  %s376_s0 = inlined_call_operand.hbm [shape: bf16[16,32], index: 0, kind: input, shape index: {}]   ;;  %s377_s1 = inlined_call_operand.hbm [shape: bf16[32,96], index: 1, kind: input, shape index: {}]   ;;  %s378_s2 = inlined_call_operand.hbm [shape: f32[1,96], index: 2, kind: input, shape index: {}]   ;;  %s379_s3 = inlined_call_operand.hbm [shape: bf16[16,96], index: 3, kind: output, shape index: {}]  }
   0x1   :  { %9 = vsyncpa [#allocation6], 0 }
   0x2   :  { %10 = vsyncpa [#allocation4], 0  ;;  %s284_s12 = smov [#allocation5]   ;;  %s285_s14 = smov [#allocation2]  }
   0x3   :  { %s28_s13 = sshll.u32 %s284_s12, 4  ;;  %s16_s15 = sshll.u32 %s285_s14, 4  ;;  %s29_s13 = int_to_ptr.vmem [resolvable:$true] %s28_s13  ;;  %s312_s15 = int_to_ptr.vmem [resolvable:$true] %s16_s15 }
   0x4   :  { %s190_s18 = scalar_lea.hbm %s377_s1, 256 }
   0x5   :  { %p191_p0 = scmp.ne.s32.totalorder %s377_s1, %s190_s18  ;;  %p194_p1 = scmp.lt.u32.totalorder %s190_s18, %s377_s1 }
   0x7   :  { %p196_p2 = pnand %p194_p1, %p191_p0 }
   0x9   :  { %199 = shalt.err (!%p196_p2)
}
   0xa   :  { %s200_s23 = scalar_lea.vmem %s29_s13, 256  ;;  %p205_p4 = scmp.lt.s32.totalorder %s29_s13, %s29_s13 }
   0xb   :  { %p201_p3 = scmp.ne.s32.totalorder %s29_s13, %s200_s23  ;;  %p206_p5 = scmp.lt.s32.totalorder %s200_s23, %s200_s23 }
   0xd   :  { %p207_p6 = por %p206_p5, %p205_p4 }
   0xf   :  { %p208_p7 = pnand %p207_p6, %p201_p3 }
  0x11   :  { %211 = shalt.err (!%p208_p7)
}
  0x12   :  { %s286_s24 = smov 64   ;;  %s287_s25 = smov 4  }
  0x13   :  { %34 = dma.hbm_to_vmem [thread:$0]  %s377_s1, 256, %s29_s13, [#allocation6], %s286_s24, %s286_s24, %s287_s25  }
  0x14   :  { %s212_s30 = scalar_lea.hbm %s376_s0, 128 }
  0x15   :  { %p213_p8 = scmp.ne.s32.totalorder %s376_s0, %s212_s30  ;;  %p216_p9 = scmp.lt.u32.totalorder %s212_s30, %s376_s0 }
  0x17   :  { %p218_p10 = pnand %p216_p9, %p213_p8 }
  0x19   :  { %221 = shalt.err (!%p218_p10)
}
  0x1a   :  { %s222_s8 = scalar_lea.vmem %s312_s15, 128  ;;  %p227_p12 = scmp.lt.s32.totalorder %s312_s15, %s312_s15 }
  0x1b   :  { %p223_p11 = scmp.ne.s32.totalorder %s312_s15, %s222_s8  ;;  %p228_p13 = scmp.lt.s32.totalorder %s222_s8, %s222_s8 }
  0x1d   :  { %p229_p0 = por %p228_p13, %p227_p12 }
  0x1f   :  { %p230_p1 = pnand %p229_p0, %p223_p11 }
  0x21   :  { %233 = shalt.err (!%p230_p1)
}
  0x22   :  { %22 = dma.hbm_to_vmem [thread:$0]  %s376_s0, 128, %s312_s15, [#allocation3], %s286_s24, %s286_s24, %s287_s25  }
  0x23   :  { %s288_s10 = smov [#allocation7]   ;;  %s234_s14 = scalar_lea.hbm %s378_s2, 16 }
  0x24   :  { %s41_s11 = sshll.u32 %s288_s10, 4  ;;  %p235_p2 = scmp.ne.s32.totalorder %s378_s2, %s234_s14  ;;  %s42_s11 = int_to_ptr.vmem [resolvable:$true] %s41_s11 }
  0x25   :  { %p238_p3 = scmp.lt.u32.totalorder %s234_s14, %s378_s2 }
  0x27   :  { %p240_p4 = pnand %p238_p3, %p235_p2 }
  0x29   :  { %243 = shalt.err (!%p240_p4)
}
  0x2a   :  { %s244_s20 = scalar_lea.vmem %s42_s11, 16  ;;  %s248_s0 = scalar_lea.vmem %s42_s11, 32 }
  0x2b   :  { %p245_p5 = scmp.ne.s32.totalorder %s42_s11, %s244_s20  ;;  %p249_p6 = scmp.lt.s32.totalorder %s42_s11, %s42_s11 }
  0x2c   :  { %p250_p7 = scmp.lt.s32.totalorder %s248_s0, %s244_s20 }
  0x2e   :  { %p251_p8 = por %p250_p7, %p249_p6 }
  0x30   :  { %p252_p9 = pnand %p251_p8, %p245_p5 }
  0x32   :  { %255 = shalt.err (!%p252_p9)
}
  0x33   :  { %44 = dma.hbm_to_vmem [thread:$0]  %s378_s2, 16, %s42_s11, [#allocation6]  }
  0x34   :  { %278 = dma.done.wait [#allocation3], 128  }
  0x35   :  { %279 = vsyncadd [#allocation3], 4294967168 }
  0x36   :  { %280 = dma.done.wait [#allocation6], 272  }
  0x37   :  { %281 = vsyncadd [#allocation6], 4294967024  ;;  %v289_v0 = vmov 0.0   ;;  %vm290_vm0 = vmmov 0   ;;  %v187_v1 = vld [vmem:[#allocation5] sm:$0xff]   ;;  %v188_v2 = vld [vmem:[#allocation5 + $0x8] sm:$0xff]  }
  0x38   :  { %171 = vmatprep.subr.bf16.mxu0 %v289_v0  ;;  %175 = vmatprep.mubr.msk.bf16.mxu0 %vm290_vm0, %v289_v0  ;;  %v189_v3 = vld [vmem:[#allocation2] sm:$0xff]   ;;  %vm85_vm1 = vcmask 261120   ;;  %v159_v4 = vld [vmem:[#allocation7] ss:$0 sm:$0xff]  ;;  %vm138_vm2 = vcmask 781312   ;;  %s291_s2 = smov [#allocation8]  }
  0x39   :  { %172 = vmatpush3.bf16.msra.mxu0 %v187_v1  ;;  %s146_s22 = sshll.u32 %s291_s2, 4  ;;  %s147_s22 = int_to_ptr.vmem [resolvable:$true] %s146_s22 }
  0x3a   :  { %173 = vmatprep.subr.bf16.mxu0 %v289_v0  ;;  %s256_s23 = scalar_lea.vmem %s147_s22, 128  ;;  %p261_p11 = scmp.lt.s32.totalorder %s147_s22, %s147_s22 }
  0x3b   :  { %p257_p10 = scmp.ne.s32.totalorder %s147_s22, %s256_s23  ;;  %p262_p12 = scmp.lt.s32.totalorder %s256_s23, %s256_s23 }
  0x3d   :  { %174 = vmatpush3.bf16.msra.mxu0 %v188_v2  ;;  %p263_p13 = por %p262_p12, %p261_p11 }
  0x3f   :  { %p264_p0 = pnand %p263_p13, %p257_p10 }
  0x40   :  { %176 = vmatmul.mubr.msk.bf16.vlgmr.msra.gmra.mrb[0].mxu0 %vm85_vm1, %v189_v3 }
 0x113   :  { %v123_v5 = vpop.f32.mrb[0].mxu0 }
 0x114   :  { %v124_v6 = vadd.f32 %v159_v4, %v123_v5  ;;  %v177_v7 = vpop.f32.mrb[1].mxu0 }
 0x115   :  { %v126_v8 = vpop.f32.mrb[2].mxu0 }
 0x116   :  { %v166_v9 = vpack.c.bf16 %v124_v6, %v124_v6  ;;  %v127_v10 = vadd.f32 %v159_v4, %v126_v8  ;;  %v178_v11 = vpop.f32.mrb[3].mxu0 }
 0x118   :  { %v167_v12 = vpack.c.bf16 %v127_v10, %v127_v10  ;;  %139 = vst.msk [vmem:[#allocation8] sm:$0xf] %vm138_vm2, %v166_v9 }
 0x11a   :  { %140 = vst.msk [vmem:[#allocation8 + $0x4] sm:$0xf] %vm138_vm2, %v167_v12 }
 0x11b   :  { %267 = shalt.err (!%p264_p0)
}
 0x11c   :  { %s268_s28 = scalar_lea.hbm %s379_s3, 128 }
 0x11d   :  { %p269_p1 = scmp.ne.s32.totalorder %s379_s3, %s268_s28  ;;  %p272_p2 = scmp.lt.u32.totalorder %s268_s28, %s379_s3 }
 0x11f   :  { %p274_p3 = pnand %p272_p2, %p269_p1 }
 0x121   :  { %277 = shalt.err (!%p274_p3)
}
 0x122   :  { %152 = dma.vmem_to_hbm [thread:$0]  %s147_s22, 128, %s379_s3, [#allocation4], %s286_s24, %s286_s24, %s287_s25  }
 0x123   :  { %282 = dma.done.wait [#allocation4], 128  }
 0x124   :  { %283 = vsyncadd [#allocation4], 4294967168 }
 0x125   :  { %156 = vsyncpa [#allocation3], 1 }
 0x126   :  { %157 = vsyncpa [#allocation6], 1 }
 0x127   :  { %158 = vsyncpa [#allocation4], 1 }

// kernel: tpu_custom_call.1
= control target key start
LH: loop header
LB: loop body
LE: loop exit
PB: predicated region body
PF: predicated region fallthrough
CT: control target
= control target key end

     0   :  { %8 = vsyncpa [#allocation3], 0  ;;  %s376_s0 = inlined_call_operand.hbm [shape: bf16[16,32], index: 0, kind: input, shape index: {}]   ;;  %s377_s1 = inlined_call_operand.hbm [shape: bf16[32,96], index: 1, kind: input, shape index: {}]   ;;  %s378_s2 = inlined_call_operand.hbm [shape: f32[1,96], index: 2, kind: input, shape index: {}]   ;;  %s379_s3 = inlined_call_operand.hbm [shape: bf16[16,96], index: 3, kind: output, shape index: {}]  }
   0x1   :  { %9 = vsyncpa [#allocation6], 0 }
   0x2   :  { %10 = vsyncpa [#allocation4], 0  ;;  %s284_s12 = smov [#allocation5]   ;;  %s285_s14 = smov [#allocation2]  }
   0x3   :  { %s28_s13 = sshll.u32 %s284_s12, 4  ;;  %s16_s15 = sshll.u32 %s285_s14, 4  ;;  %s29_s13 = int_to_ptr.vmem [resolvable:$true] %s28_s13  ;;  %s312_s15 = int_to_ptr.vmem [resolvable:$true] %s16_s15 }
   0x4   :  { %s190_s18 = scalar_lea.hbm %s377_s1, 256 }
   0x5   :  { %p191_p0 = scmp.ne.s32.totalorder %s377_s1, %s190_s18  ;;  %p194_p1 = scmp.lt.u32.totalorder %s190_s18, %s377_s1 }
   0x7   :  { %p196_p2 = pnand %p194_p1, %p191_p0 }
   0x9   :  { %199 = shalt.err (!%p196_p2)
}
   0xa   :  { %s200_s23 = scalar_lea.vmem %s29_s13, 256  ;;  %p205_p4 = scmp.lt.s32.totalorder %s29_s13, %s29_s13 }
   0xb   :  { %p201_p3 = scmp.ne.s32.totalorder %s29_s13, %s200_s23  ;;  %p206_p5 = scmp.lt.s32.totalorder %s200_s23, %s200_s23 }
   0xd   :  { %p207_p6 = por %p206_p5, %p205_p4 }
   0xf   :  { %p208_p7 = pnand %p207_p6, %p201_p3 }
  0x11   :  { %211 = shalt.err (!%p208_p7)
}
  0x12   :  { %s286_s24 = smov 64   ;;  %s287_s25 = smov 4  }
  0x13   :  { %34 = dma.hbm_to_vmem [thread:$0]  %s377_s1, 256, %s29_s13, [#allocation6], %s286_s24, %s286_s24, %s287_s25  }
  0x14   :  { %s212_s30 = scalar_lea.hbm %s376_s0, 128 }
  0x15   :  { %p213_p8 = scmp.ne.s32.totalorder %s376_s0, %s212_s30  ;;  %p216_p9 = scmp.lt.u32.totalorder %s212_s30, %s376_s0 }
  0x17   :  { %p218_p10 = pnand %p216_p9, %p213_p8 }
  0x19   :  { %221 = shalt.err (!%p218_p10)
}
  0x1a   :  { %s222_s8 = scalar_lea.vmem %s312_s15, 128  ;;  %p227_p12 = scmp.lt.s32.totalorder %s312_s15, %s312_s15 }
  0x1b   :  { %p223_p11 = scmp.ne.s32.totalorder %s312_s15, %s222_s8  ;;  %p228_p13 = scmp.lt.s32.totalorder %s222_s8, %s222_s8 }
  0x1d   :  { %p229_p0 = por %p228_p13, %p227_p12 }
  0x1f   :  { %p230_p1 = pnand %p229_p0, %p223_p11 }
  0x21   :  { %233 = shalt.err (!%p230_p1)
}
  0x22   :  { %22 = dma.hbm_to_vmem [thread:$0]  %s376_s0, 128, %s312_s15, [#allocation3], %s286_s24, %s286_s24, %s287_s25  }
  0x23   :  { %s288_s10 = smov [#allocation7]   ;;  %s234_s14 = scalar_lea.hbm %s378_s2, 16 }
  0x24   :  { %s41_s11 = sshll.u32 %s288_s10, 4  ;;  %p235_p2 = scmp.ne.s32.totalorder %s378_s2, %s234_s14  ;;  %s42_s11 = int_to_ptr.vmem [resolvable:$true] %s41_s11 }
  0x25   :  { %p238_p3 = scmp.lt.u32.totalorder %s234_s14, %s378_s2 }
  0x27   :  { %p240_p4 = pnand %p238_p3, %p235_p2 }
  0x29   :  { %243 = shalt.err (!%p240_p4)
}
  0x2a   :  { %s244_s20 = scalar_lea.vmem %s42_s11, 16  ;;  %s248_s0 = scalar_lea.vmem %s42_s11, 32 }
  0x2b   :  { %p245_p5 = scmp.ne.s32.totalorder %s42_s11, %s244_s20  ;;  %p249_p6 = scmp.lt.s32.totalorder %s42_s11, %s42_s11 }
  0x2c   :  { %p250_p7 = scmp.lt.s32.totalorder %s248_s0, %s244_s20 }
  0x2e   :  { %p251_p8 = por %p250_p7, %p249_p6 }
  0x30   :  { %p252_p9 = pnand %p251_p8, %p245_p5 }
  0x32   :  { %255 = shalt.err (!%p252_p9)
}
  0x33   :  { %44 = dma.hbm_to_vmem [thread:$0]  %s378_s2, 16, %s42_s11, [#allocation6]  }
  0x34   :  { %278 = dma.done.wait [#allocation3], 128  }
  0x35   :  { %279 = vsyncadd [#allocation3], 4294967168 }
  0x36   :  { %280 = dma.done.wait [#allocation6], 272  }
  0x37   :  { %281 = vsyncadd [#allocation6], 4294967024  ;;  %v289_v0 = vmov 0.0   ;;  %vm290_vm0 = vmmov 0   ;;  %v187_v1 = vld [vmem:[#allocation5] sm:$0xff]   ;;  %v188_v2 = vld [vmem:[#allocation5 + $0x8] sm:$0xff]  }
  0x38   :  { %171 = vmatprep.subr.bf16.mxu0 %v289_v0  ;;  %175 = vmatprep.mubr.msk.bf16.mxu0 %vm290_vm0, %v289_v0  ;;  %v189_v3 = vld [vmem:[#allocation2] sm:$0xff]   ;;  %vm85_vm1 = vcmask 261120   ;;  %v159_v4 = vld [vmem:[#allocation7] ss:$0 sm:$0xff]  ;;  %vm138_vm2 = vcmask 781312   ;;  %s291_s2 = smov [#allocation8]  }
  0x39   :  { %172 = vmatpush3.bf16.msra.mxu0 %v187_v1  ;;  %s146_s22 = sshll.u32 %s291_s2, 4  ;;  %s147_s22 = int_to_ptr.vmem [resolvable:$true] %s146_s22 }
  0x3a   :  { %173 = vmatprep.subr.bf16.mxu0 %v289_v0  ;;  %s256_s23 = scalar_lea.vmem %s147_s22, 128  ;;  %p261_p11 = scmp.lt.s32.totalorder %s147_s22, %s147_s22 }
  0x3b   :  { %p257_p10 = scmp.ne.s32.totalorder %s147_s22, %s256_s23  ;;  %p262_p12 = scmp.lt.s32.totalorder %s256_s23, %s256_s23 }
  0x3d   :  { %174 = vmatpush3.bf16.msra.mxu0 %v188_v2  ;;  %p263_p13 = por %p262_p12, %p261_p11 }
  0x3f   :  { %p264_p0 = pnand %p263_p13, %p257_p10 }
  0x40   :  { %176 = vmatmul.mubr.msk.bf16.vlgmr.msra.gmra.mrb[0].mxu0 %vm85_vm1, %v189_v3 }
 0x113   :  { %v123_v5 = vpop.f32.mrb[0].mxu0 }
 0x114   :  { %v124_v6 = vadd.f32 %v159_v4, %v123_v5  ;;  %v177_v7 = vpop.f32.mrb[1].mxu0 }
 0x115   :  { %v126_v8 = vpop.f32.mrb[2].mxu0 }
 0x116   :  { %v166_v9 = vpack.c.bf16 %v124_v6, %v124_v6  ;;  %v127_v10 = vadd.f32 %v159_v4, %v126_v8  ;;  %v178_v11 = vpop.f32.mrb[3].mxu0 }
 0x118   :  { %v167_v12 = vpack.c.bf16 %v127_v10, %v127_v10  ;;  %139 = vst.msk [vmem:[#allocation8] sm:$0xf] %vm138_vm2, %v166_v9 }
 0x11a   :  { %140 = vst.msk [vmem:[#allocation8 + $0x4] sm:$0xf] %vm138_vm2, %v167_v12 }
 0x11b   :  { %267 = shalt.err (!%p264_p0)
}
 0x11c   :  { %s268_s28 = scalar_lea.hbm %s379_s3, 128 }
 0x11d   :  { %p269_p1 = scmp.ne.s32.totalorder %s379_s3, %s268_s28  ;;  %p272_p2 = scmp.lt.u32.totalorder %s268_s28, %s379_s3 }
 0x11f   :  { %p274_p3 = pnand %p272_p2, %p269_p1 }
 0x121   :  { %277 = shalt.err (!%p274_p3)
}
 0x122   :  { %152 = dma.vmem_to_hbm [thread:$0]  %s147_s22, 128, %s379_s3, [#allocation4], %s286_s24, %s286_s24, %s287_s25  }
 0x123   :  { %282 = dma.done.wait [#allocation4], 128  }
 0x124   :  { %283 = vsyncadd [#allocation4], 4294967168 }
 0x125   :  { %156 = vsyncpa [#allocation3], 1 }
 0x126   :  { %157 = vsyncpa [#allocation6], 1 }
 0x127   :  { %158 = vsyncpa [#allocation4], 1 }

</bundles_post_ra>
